<compile_context>
chip_gen: v7x
topology: tpu7x:2x2x1
jax: 0.10.0
libtpu: 0.0.40
codegen_flags: <defaults>
</compile_context>

<pallas_src>
import functools

import jax
import jax.numpy as jnp
from jax.experimental import pallas as pl
from jax.experimental.pallas import tpu as pltpu


def _interp_matrix(in_size, out_size, mode, align_corners=False, dtype=jnp.float32):
    """(out_size, in_size) matrix M with out = M @ in along one axis, matching
    torch.nn.functional.interpolate semantics."""
    dst = jnp.arange(out_size, dtype=jnp.float32)
    if mode == "nearest":
        scale = in_size / out_size
        idx = jnp.minimum(jnp.floor(dst * scale).astype(jnp.int32), in_size - 1)
        m = jnp.zeros((out_size, in_size), dtype)
        return m.at[jnp.arange(out_size), idx].set(1.0)
    if mode != "bilinear":
        # TODO(synk): other interpolate modes (bicubic, trilinear, area) not implemented.
        raise NotImplementedError(f"mode={mode!r} not supported")
    if align_corners and out_size > 1:
        src = dst * (in_size - 1) / (out_size - 1)
    else:
        scale = in_size / out_size
        src = (dst + 0.5) * scale - 0.5
        src = jnp.maximum(src, 0.0)  # PyTorch clamps negative source coords to 0
    i0 = jnp.minimum(jnp.floor(src).astype(jnp.int32), in_size - 1)
    i1 = jnp.minimum(i0 + 1, in_size - 1)
    frac = (src - i0.astype(jnp.float32)).astype(dtype)
    rows = jnp.arange(out_size)
    m = jnp.zeros((out_size, in_size), dtype)
    m = m.at[rows, i0].add(1.0 - frac)
    m = m.at[rows, i1].add(frac)
    return m


def _upsample_kernel(x_ref, ah_ref, awt_ref, o_ref):
    # x_ref  : (1, C, H, W)          one image, NCHW (W on lanes)
    # ah_ref : (H_out, H)            height interpolation matrix
    # awt_ref: (W, W_out)            width interpolation matrix, pre-transposed
    # o_ref  : (1, C, H_out, W_out)
    C = x_ref.shape[1]
    ah = ah_ref[...]
    awt = awt_ref[...]
    for c in range(C):  # static unroll; channel count is small
        xc = x_ref[0, c]                                             # (H, W)
        th = jnp.dot(ah, xc, preferred_element_type=jnp.float32)     # (H_out, W)
        oc = jnp.dot(th, awt, preferred_element_type=jnp.float32)    # (H_out, W_out)
        o_ref[0, c] = oc.astype(o_ref.dtype)


@functools.partial(jax.jit, static_argnames=("scale_factor", "mode", "align_corners"))
def upsample2_forward(x, scale_factor=2, mode="bilinear", align_corners=False):
    """x: (B, C, H, W). Returns (B, C, H*s, W*s) — same as Upsample2.forward."""
    B, C, H, W = x.shape
    H_out = int(H * scale_factor)
    W_out = int(W * scale_factor)

    ah = _interp_matrix(H, H_out, mode, align_corners, x.dtype)       # (H_out, H)
    awt = _interp_matrix(W, W_out, mode, align_corners, x.dtype).T    # (W, W_out)

    flops = int(2 * B * C * (H_out * H * W + H_out * W * W_out))
    bytes_accessed = int(4 * (x.size + B * C * H_out * W_out + ah.size + awt.size))

    return pl.pallas_call(
        _upsample_kernel,
        out_shape=jax.ShapeDtypeStruct((B, C, H_out, W_out), x.dtype),
        grid_spec=pltpu.PrefetchScalarGridSpec(
            num_scalar_prefetch=0,
            grid=(B,),
            in_specs=[
                pl.BlockSpec((1, C, H, W), lambda b: (b, 0, 0, 0)),
                pl.BlockSpec((H_out, H), lambda b: (0, 0)),
                pl.BlockSpec((W, W_out), lambda b: (0, 0)),
            ],
            out_specs=pl.BlockSpec((1, C, H_out, W_out), lambda b: (b, 0, 0, 0)),
        ),
        compiler_params=pltpu.CompilerParams(
            dimension_semantics=("parallel",),
            vmem_limit_bytes=32 * 1024 * 1024,
        ),
        cost_estimate=pl.CostEstimate(
            flops=flops, transcendentals=0, bytes_accessed=bytes_accessed),
    )(x, ah, awt)


def _reference_upsample_bilinear(x, scale_factor):
    """Pure-JAX gather-based reference of F.interpolate(mode='bilinear',
    align_corners=False) — implements the PyTorch formula directly."""
    B, C, H, W = x.shape
    H_out, W_out = int(H * scale_factor), int(W * scale_factor)

    def coords(in_size, out_size):
        s = in_size / out_size
        src = (jnp.arange(out_size, dtype=jnp.float32) + 0.5) * s - 0.5
        src = jnp.maximum(src, 0.0)
        i0 = jnp.minimum(jnp.floor(src).astype(jnp.int32), in_size - 1)
        i1 = jnp.minimum(i0 + 1, in_size - 1)
        frac = src - i0.astype(jnp.float32)
        return i0, i1, frac

    h0, h1, fh = coords(H, H_out)
    w0, w1, fw = coords(W, W_out)
    top = (x[:, :, h0, :] * (1.0 - fh)[None, None, :, None]
           + x[:, :, h1, :] * fh[None, None, :, None])                 # (B,C,H_out,W)
    out = (top[:, :, :, w0] * (1.0 - fw)[None, None, None, :]
           + top[:, :, :, w1] * fw[None, None, None, :])               # (B,C,H_out,W_out)
    return out


if __name__ == "__main__":
    # Small shapes consistent with the module: batch=2, channels=4, 16x16 spatial,
    # scale_factor=2, mode='bilinear'.
    B, C, H, W = 2, 4, 16, 16
    factor = 2

    x = jax.random.normal(jax.random.PRNGKey(0), (B, C, H, W), dtype=jnp.float32)

    out = upsample2_forward(x, scale_factor=factor, mode="bilinear")
    out = jax.block_until_ready(out)

    ref = _reference_upsample_bilinear(x, factor)
    assert out.shape == (B, C, H * factor, W * factor)
    assert jnp.allclose(out, ref, atol=1e-5, rtol=1e-5), "mismatch vs reference"

    print("KERNEL_OK")
</pallas_src>

<mosaic_0001>
module attributes {stable_mosaic.version = 11 : i64} {
  func.func private @main(%arg0: i32) attributes {dimension_semantics = [#tpu.dimension_semantics<core_parallel>], iteration_bounds = array<i64: 2>, tpu.core_type = #tpu.core_type<sc_scalar_subcore>, window_params = []} {
    return
  }
}

module attributes {stable_mosaic.version = 11 : i64} {
  func.func private @main(%arg0: i32) attributes {dimension_semantics = [#tpu.dimension_semantics<core_parallel>], iteration_bounds = array<i64: 2>, tpu.core_type = #tpu.core_type<sc_scalar_subcore>, window_params = []} {
    return
  }
}

module attributes {stable_mosaic.version = 11 : i64} {
  func.func @_upsample_kernel(%arg0: i32, %arg1: memref<1x4x16x16xf32, #tpu.memory_space<vmem>>, %arg2: memref<32x16xf32, #tpu.memory_space<vmem>>, %arg3: memref<16x32xf32, #tpu.memory_space<vmem>>, %arg4: memref<1x4x32x32xf32, #tpu.memory_space<vmem>>) attributes {dimension_semantics = [#tpu.dimension_semantics<parallel>], iteration_bounds = array<i64: 2>, scalar_prefetch = 0 : i64, scratch_operands = 0 : i64, tpu.core_type = #tpu.core_type<tc>, window_params = [{transform_indices = @transform_0, window_bounds = array<i64: 1, 4, 16, 16>}, {pipeline_mode = #tpu.pipeline_mode<synchronous>, transform_indices = @transform_1, window_bounds = array<i64: 32, 16>}, {pipeline_mode = #tpu.pipeline_mode<synchronous>, transform_indices = @transform_2, window_bounds = array<i64: 16, 32>}, {transform_indices = @transform_3, window_bounds = array<i64: 1, 4, 32, 32>}]} {
    %c0 = arith.constant 0 : index
    %c0_0 = arith.constant 0 : index
    %0 = vector.load %arg2[%c0, %c0_0] : memref<32x16xf32, #tpu.memory_space<vmem>>, vector<32x16xf32>
    %c0_1 = arith.constant 0 : index
    %c0_2 = arith.constant 0 : index
    %1 = vector.load %arg3[%c0_1, %c0_2] : memref<16x32xf32, #tpu.memory_space<vmem>>, vector<16x32xf32>
    %c0_3 = arith.constant 0 : index
    %c0_4 = arith.constant 0 : index
    %c0_5 = arith.constant 0 : index
    %c0_6 = arith.constant 0 : index
    %2 = vector.load %arg1[%c0_3, %c0_4, %c0_5, %c0_6] : memref<1x4x16x16xf32, #tpu.memory_space<vmem>>, vector<1x1x16x16xf32>
    %3 = vector.shape_cast %2 : vector<1x1x16x16xf32> to vector<16x16xf32>
    %cst = arith.constant dense<0.000000e+00> : vector<32x16xf32>
    %4 = tpu.matmul %0, %3, %cst {dimension_numbers = #tpu.dot_dimension_numbers<[1], [0], [0], [1], [0, 0, 1, 1], [], []>} : vector<32x16xf32>, vector<16x16xf32>, vector<32x16xf32> -> vector<32x16xf32>
    %cst_7 = arith.constant dense<0.000000e+00> : vector<32x32xf32>
    %5 = tpu.matmul %4, %1, %cst_7 {dimension_numbers = #tpu.dot_dimension_numbers<[1], [0], [0], [1], [0, 0, 1, 1], [], []>} : vector<32x16xf32>, vector<16x32xf32>, vector<32x32xf32> -> vector<32x32xf32>
    %c0_8 = arith.constant 0 : index
    %c0_9 = arith.constant 0 : index
    %c0_10 = arith.constant 0 : index
    %c0_11 = arith.constant 0 : index
    %6 = vector.load %arg4[%c0_8, %c0_9, %c0_10, %c0_11] : memref<1x4x32x32xf32, #tpu.memory_space<vmem>>, vector<1x1x32x32xf32>
    %7 = vector.shape_cast %6 : vector<1x1x32x32xf32> to vector<32x32xf32>
    %8 = vector.shape_cast %5 : vector<32x32xf32> to vector<1x1x32x32xf32>
    tpu.vector_store %arg4[%c0_8, %c0_9, %c0_10, %c0_11], %8 {strides = array<i32>} : memref<1x4x32x32xf32, #tpu.memory_space<vmem>>, vector<1x1x32x32xf32>,
    %c0_12 = arith.constant 0 : index
    %c1 = arith.constant 1 : index
    %c0_13 = arith.constant 0 : index
    %c0_14 = arith.constant 0 : index
    %9 = vector.load %arg1[%c0_12, %c1, %c0_13, %c0_14] : memref<1x4x16x16xf32, #tpu.memory_space<vmem>>, vector<1x1x16x16xf32>
    %10 = vector.shape_cast %9 : vector<1x1x16x16xf32> to vector<16x16xf32>
    %cst_15 = arith.constant dense<0.000000e+00> : vector<32x16xf32>
    %11 = tpu.matmul %0, %10, %cst_15 {dimension_numbers = #tpu.dot_dimension_numbers<[1], [0], [0], [1], [0, 0, 1, 1], [], []>} : vector<32x16xf32>, vector<16x16xf32>, vector<32x16xf32> -> vector<32x16xf32>
    %cst_16 = arith.constant dense<0.000000e+00> : vector<32x32xf32>
    %12 = tpu.matmul %11, %1, %cst_16 {dimension_numbers = #tpu.dot_dimension_numbers<[1], [0], [0], [1], [0, 0, 1, 1], [], []>} : vector<32x16xf32>, vector<16x32xf32>, vector<32x32xf32> -> vector<32x32xf32>
    %c0_17 = arith.constant 0 : index
    %c1_18 = arith.constant 1 : index
    %c0_19 = arith.constant 0 : index
    %c0_20 = arith.constant 0 : index
    %13 = vector.load %arg4[%c0_17, %c1_18, %c0_19, %c0_20] : memref<1x4x32x32xf32, #tpu.memory_space<vmem>>, vector<1x1x32x32xf32>
    %14 = vector.shape_cast %13 : vector<1x1x32x32xf32> to vector<32x32xf32>
    %15 = vector.shape_cast %12 : vector<32x32xf32> to vector<1x1x32x32xf32>
    tpu.vector_store %arg4[%c0_17, %c1_18, %c0_19, %c0_20], %15 {strides = array<i32>} : memref<1x4x32x32xf32, #tpu.memory_space<vmem>>, vector<1x1x32x32xf32>,
    %c0_21 = arith.constant 0 : index
    %c2 = arith.constant 2 : index
    %c0_22 = arith.constant 0 : index
    %c0_23 = arith.constant 0 : index
    %16 = vector.load %arg1[%c0_21, %c2, %c0_22, %c0_23] : memref<1x4x16x16xf32, #tpu.memory_space<vmem>>, vector<1x1x16x16xf32>
    %17 = vector.shape_cast %16 : vector<1x1x16x16xf32> to vector<16x16xf32>
    %cst_24 = arith.constant dense<0.000000e+00> : vector<32x16xf32>
    %18 = tpu.matmul %0, %17, %cst_24 {dimension_numbers = #tpu.dot_dimension_numbers<[1], [0], [0], [1], [0, 0, 1, 1], [], []>} : vector<32x16xf32>, vector<16x16xf32>, vector<32x16xf32> -> vector<32x16xf32>
    %cst_25 = arith.constant dense<0.000000e+00> : vector<32x32xf32>
    %19 = tpu.matmul %18, %1, %cst_25 {dimension_numbers = #tpu.dot_dimension_numbers<[1], [0], [0], [1], [0, 0, 1, 1], [], []>} : vector<32x16xf32>, vector<16x32xf32>, vector<32x32xf32> -> vector<32x32xf32>
    %c0_26 = arith.constant 0 : index
    %c2_27 = arith.constant 2 : index
    %c0_28 = arith.constant 0 : index
    %c0_29 = arith.constant 0 : index
    %20 = vector.load %arg4[%c0_26, %c2_27, %c0_28, %c0_29] : memref<1x4x32x32xf32, #tpu.memory_space<vmem>>, vector<1x1x32x32xf32>
    %21 = vector.shape_cast %20 : vector<1x1x32x32xf32> to vector<32x32xf32>
    %22 = vector.shape_cast %19 : vector<32x32xf32> to vector<1x1x32x32xf32>
    tpu.vector_store %arg4[%c0_26, %c2_27, %c0_28, %c0_29], %22 {strides = array<i32>} : memref<1x4x32x32xf32, #tpu.memory_space<vmem>>, vector<1x1x32x32xf32>,
    %c0_30 = arith.constant 0 : index
    %c3 = arith.constant 3 : index
    %c0_31 = arith.constant 0 : index
    %c0_32 = arith.constant 0 : index
    %23 = vector.load %arg1[%c0_30, %c3, %c0_31, %c0_32] : memref<1x4x16x16xf32, #tpu.memory_space<vmem>>, vector<1x1x16x16xf32>
    %24 = vector.shape_cast %23 : vector<1x1x16x16xf32> to vector<16x16xf32>
    %cst_33 = arith.constant dense<0.000000e+00> : vector<32x16xf32>
    %25 = tpu.matmul %0, %24, %cst_33 {dimension_numbers = #tpu.dot_dimension_numbers<[1], [0], [0], [1], [0, 0, 1, 1], [], []>} : vector<32x16xf32>, vector<16x16xf32>, vector<32x16xf32> -> vector<32x16xf32>
    %cst_34 = arith.constant dense<0.000000e+00> : vector<32x32xf32>
    %26 = tpu.matmul %25, %1, %cst_34 {dimension_numbers = #tpu.dot_dimension_numbers<[1], [0], [0], [1], [0, 0, 1, 1], [], []>} : vector<32x16xf32>, vector<16x32xf32>, vector<32x32xf32> -> vector<32x32xf32>
    %c0_35 = arith.constant 0 : index
    %c3_36 = arith.constant 3 : index
    %c0_37 = arith.constant 0 : index
    %c0_38 = arith.constant 0 : index
    %27 = vector.load %arg4[%c0_35, %c3_36, %c0_37, %c0_38] : memref<1x4x32x32xf32, #tpu.memory_space<vmem>>, vector<1x1x32x32xf32>
    %28 = vector.shape_cast %27 : vector<1x1x32x32xf32> to vector<32x32xf32>
    %29 = vector.shape_cast %26 : vector<32x32xf32> to vector<1x1x32x32xf32>
    tpu.vector_store %arg4[%c0_35, %c3_36, %c0_37, %c0_38], %29 {strides = array<i32>} : memref<1x4x32x32xf32, #tpu.memory_space<vmem>>, vector<1x1x32x32xf32>,
    return
  }
  func.func @transform_0(%arg0: i32) -> (i32, i32, i32, i32) {
    %c0_i32 = arith.constant 0 : i32
    %c0_i32_0 = arith.constant 0 : i32
    %c0_i32_1 = arith.constant 0 : i32
    %c0_i32_2 = arith.constant 0 : i32
    return %arg0, %c0_i32, %c0_i32_0, %c0_i32_1 : i32, i32, i32, i32
  }
  func.func @transform_1(%arg0: i32) -> (i32, i32) {
    %c0_i32 = arith.constant 0 : i32
    %c0_i32_0 = arith.constant 0 : i32
    %c0_i32_1 = arith.constant 0 : i32
    return %c0_i32, %c0_i32_0 : i32, i32
  }
  func.func @transform_2(%arg0: i32) -> (i32, i32) {
    %c0_i32 = arith.constant 0 : i32
    %c0_i32_0 = arith.constant 0 : i32
    %c0_i32_1 = arith.constant 0 : i32
    return %c0_i32, %c0_i32_0 : i32, i32
  }
  func.func @transform_3(%arg0: i32) -> (i32, i32, i32, i32) {
    %c0_i32 = arith.constant 0 : i32
    %c0_i32_0 = arith.constant 0 : i32
    %c0_i32_1 = arith.constant 0 : i32
    %c0_i32_2 = arith.constant 0 : i32
    return %arg0, %c0_i32, %c0_i32_0, %c0_i32_1 : i32, i32, i32, i32
  }
}

</mosaic_0001>

<bundles_post_ra>
// kernel: upsample2_forward.1
= control target key start
LH: loop header
LB: loop body
LE: loop exit
PB: predicated region body
PF: predicated region fallthrough
CT: control target
= control target key end

     0   :  { %8 = vsyncpa [#allocation3], 0  ;;  %s1577_s0 = inlined_call_operand.vmem [shape: f32[2,4,16,16], index: 0, kind: input, shape index: {}]   ;;  %s1578_s1 = inlined_call_operand.vmem [shape: f32[32,16], index: 1, kind: input, shape index: {}]   ;;  %s1579_s2 = inlined_call_operand.vmem [shape: f32[16,32], index: 2, kind: input, shape index: {}]   ;;  %s1580_s3 = inlined_call_operand.hbm [shape: f32[2,4,32,32], index: 3, kind: output, shape index: {}]  }
   0x1   :  { %10 = vsyncpa [#allocation3 + $0x1], 0  ;;  %s1375_s12 = smov 0   ;;  %s1377_s13 = smov 0  }
   0x2   :  { %s1379_s14 = smov 0   ;;  %s1381_s15 = smov 0  }
   0x3 LB: > { %s1396_s16 = sadd.s32 4294967295, %s1350_s15   ;;  %s1023_s17 = sadd.s32 4294967294, %s1350_s15   ;;  %s1350_s15 = sphi %s1381_s15, %s1586_s15   ;;  %s1346_s14 = sphi %s1379_s14, %s1585_s14   ;;  %s1342_s13 = sphi %s1377_s13, %s1584_s13   ;;  %s1338_s12 = sphi %s1375_s12, %s1583_s12  }
   0x4   : > { %s1400_s18 = sadd.s32 1, %s1350_s15   ;;  %s91_s19 = sadd.s32 1, %s1346_s14 }
   0x5   : > { %s88_s20 = ssub.s32 %s1350_s15, %s1400_s18  ;;  %p101_p0 = scmp.ne.s32.totalorder %s1346_s14, %s1342_s13 }
   0x6   : > { %p89_p1 = scmp.eq.s32.totalorder %s88_s20, 0  ;;  %p102_p2 = scmp.eq.s32.totalorder %s1396_s16, 1 }
   0x7   : > { %p107_p3 = scmp.ne.s32.totalorder %s1342_s13, %s1338_s12  ;;  %p108_p4 = scmp.eq.s32.totalorder %s1023_s17, 1 }
   0x8   : > { %s1411_s21 = scalar_select %p89_p1, %s1346_s14, %s91_s19  }
   0x9   : > { %p1413_p5 = por %p102_p2, %p101_p0  ;;  %p1417_p6 = por %p108_p4, %p107_p3 }
   0xa   : > { %p1026_p7 = scmp.ge.s32.totalorder %s1350_s15, 1  ;;  %p140_p8 = scmp.lt.s32.totalorder %s1350_s15, 3 }
   0xc   : > { %p141_p9 = pnand %p1026_p7, %p140_p8 }
   0xd   : > { %p164_p10 = scmp.lt.s32.totalorder (!%p141_p9), %s1396_s16, 1  ;;  %v169_v0 = vld [vmem:[%s1578_s1] sm:$0xff] (!%p141_p9)  ;;  %vm177_vm0 = vcmask (!%p141_p9), 130048   ;;  %v174_v2 = vld [vmem:[%s1579_s2 + $0x8] sm:$0xff] (!%p141_p9)  ;;  %v171_v13 = vld [vmem:[%s1578_s1 + $0x10] sm:$0xff] (!%p141_p9)  ;;  %s161_s20 = sand.u32 (!%p141_p9), 1, %s1342_s13  }
   0xe   : > { %144 = sbr.rel (%p141_p9) target bundleno = 502 (0x1f6), region = 32  ;;  %1139 = vmatprep.mubr.msk.f32.mxu0 (!%p141_p9), %vm177_vm0, %v169_v0  ;;  %v173_v1 = vld [vmem:[%s1579_s2] sm:$0xff] (!%p141_p9)  ;;  %v170_v12 = vld [vmem:[%s1578_s1 + $0x8] sm:$0xff] (!%p141_p9)  ;;  %v172_v15 = vld [vmem:[%s1578_s1 + $0x18] sm:$0xff] (!%p141_p9)  ;;  %s1027_s24 = sshll.u32 (!%p141_p9), %s161_s20, 7  ;;  %vm372_vm1 = vcmask (!%p141_p9), 261120  }
   0xf   : > { %v1435_v3 = vpack.c.bf16 (!%p141_p9), %v174_v2, %v173_v1  ;;  %s1491_s25 = scalar_lea.vmem (!%p141_p9), [#allocation2], %s1027_s24  ;;  %s1086_s26 = sshll.u32 (!%p141_p9), %s1396_s16, 11 }
  0x10   : > { %s961_s27 = sshll.u32 (!%p141_p9), %s1491_s25, 4  ;;  %s1352_s5 = smov (!%p141_p9), [#allocation2]   ;;  %s1528_s27 = int_to_ptr.vmem [resolvable:$true] %s961_s27 }
  0x11   : > { %1220 = vmatprep.subr.bf16.mxu1 (!%p141_p9), %v1435_v3  ;;  %s1292_s6 = sshll.u32 (!%p141_p9), %s1352_s5, 4  ;;  %s1293_s6 = int_to_ptr.vmem [resolvable:$false] %s1292_s6 }
  0x12   : > { %1222 = vmatpush3.bf16.msra.mxu1 (!%p141_p9), %v1435_v3  ;;  %p1295_p0 = scmp.lt.s32.totalorder (!%p141_p9), %s1528_s27, %s1293_s6 }
  0x13   : > { %1228 = vmatprep.subr.bf16.mxu1 (!%p141_p9), %v1435_v3 }
  0x15   : > { %s165_s30 = scalar_select %p164_p10, %s1396_s16, 1 }
  0x16   : > { %s1536_s16 = scalar_lea.sflag [#allocation3], %s161_s20 }
  0x17   : > { %s1085_s4 = sshll.u32 %s165_s30, 6  ;;  %s1526_s30 = scalar_lea.hbm %s1580_s3, %s1086_s26 }
  0x18   : > { %s168_s7 = scalar_lea.vmem %s1577_s0, %s1085_s4  ;;  %s1288_s4 = scalar_lea.vmem %s1528_s27, 2048 }
  0x19   : > { %v175_v4 = vld [vmem:[%s168_s7] sm:$0xff]  ;;  %v176_v5 = vld [vmem:[%s168_s7 + $0x8] sm:$0xff]  ;;  %v1038_v6 = vld [vmem:[%s168_s7 + $0x10] sm:$0xff]  ;;  %p1289_p11 = scmp.ne.s32.totalorder %s1528_s27, %s1288_s4 }
  0x1a   : > { %v1215_v7 = vpack.c.bf16 %v176_v5, %v175_v4  ;;  %v1039_v8 = vld [vmem:[%s168_s7 + $0x18] sm:$0xff]  ;;  %v1052_v10 = vld [vmem:[%s168_s7 + $0x20] sm:$0xff]  ;;  %v1053_v11 = vld [vmem:[%s168_s7 + $0x28] sm:$0xff] }
  0x1b   : > { %v1223_v9 = vpack.c.bf16 %v1039_v8, %v1038_v6  ;;  %v1231_v14 = vpack.c.bf16 %v1053_v11, %v1052_v10  ;;  %v1066_v16 = vld [vmem:[%s168_s7 + $0x30] sm:$0xff]  ;;  %v1067_v17 = vld [vmem:[%s168_s7 + $0x38] sm:$0xff]  ;;  %p1290_p12 = pnand %p1289_p11, %p1413_p5  ;;  %s1294_s7 = scalar_lea.vmem %s1293_s6, 4096 }
  0x1c   : > { %1216 = vmatprep.subr.bf16.mxu0 %v1215_v7  ;;  %v1239_v18 = vpack.c.bf16 %v1067_v17, %v1066_v16  ;;  %p1296_p1 = scmp.lt.s32.totalorder %s1294_s7, %s1288_s4 }
  0x1d   : > { %1218 = vmatpush3.bf16.msra.mxu0 %v1215_v7  ;;  %p1291_p13 = pneg %p1290_p12 }
  0x1e   : > { %1224 = vmatprep.subr.bf16.mxu0 %v1223_v9  ;;  %p1297_p2 = por %p1296_p1, %p1295_p0 }
  0x20   : > { %1140 = vmatmul.mubr.msk.f32.vlgmr.msra.gmra.mrb[0].mxu0 %vm177_vm0, %v170_v12  ;;  %p1298_p3 = pnand %p1297_p2, %p1291_p13 }
  0x21   : > { %1226 = vmatpush3.bf16.msra.mxu0 %v1223_v9  ;;  %1142 = vmatprep.mubr.msk.f32.mxu0 %vm177_vm0, %v171_v13 }
  0x22   : > { %1232 = vmatprep.subr.bf16.mxu0 %v1231_v14 }
  0x24   : > { %1143 = vmatmul.mubr.msk.f32.gmra.mrb[2].mxu0 %vm177_vm0, %v172_v15 }
  0x25   : > { %1159 = vmatprep.mubr.msk.f32.mxu0 %vm177_vm0, %v169_v0 }
  0x28   : > { %1160 = vmatmul.mubr.msk.f32.vlgmr.msra.gmra.mrb[4].mxu0 %vm177_vm0, %v170_v12 }
  0x29   : > { %1234 = vmatpush3.bf16.msra.mxu0 %v1231_v14  ;;  %1162 = vmatprep.mubr.msk.f32.mxu0 %vm177_vm0, %v171_v13 }
  0x2a   : > { %1240 = vmatprep.subr.bf16.mxu0 %v1239_v18 }
  0x2c   : > { %1163 = vmatmul.mubr.msk.f32.gmra.mrb[6].mxu0 %vm177_vm0, %v172_v15 }
  0x2d   : > { %1179 = vmatprep.mubr.msk.f32.mxu0 %vm177_vm0, %v169_v0 }
  0x30   : > { %1180 = vmatmul.mubr.msk.f32.vlgmr.msra.gmra.mrb[8].mxu0 %vm177_vm0, %v170_v12 }
  0x31   : > { %1242 = vmatpush3.bf16.msra.mxu0 %v1239_v18  ;;  %1182 = vmatprep.mubr.msk.f32.mxu0 %vm177_vm0, %v171_v13 }
  0x34   : > { %1183 = vmatmul.mubr.msk.f32.gmra.mrb[10].mxu0 %vm177_vm0, %v172_v15 }
  0x35   : > { %1199 = vmatprep.mubr.msk.f32.mxu0 %vm177_vm0, %v169_v0 }
  0x38   : > { %1200 = vmatmul.mubr.msk.f32.vlgmr.msra.gmra.mrb[12].mxu0 %vm177_vm0, %v170_v12 }
  0x39   : > { %1202 = vmatprep.mubr.msk.f32.mxu0 %vm177_vm0, %v171_v13 }
  0x3c   : > { %1203 = vmatmul.mubr.msk.f32.gmra.mrb[14].mxu0 %vm177_vm0, %v172_v15 }
  0xf3   : > { %v1141_v19 = vpop.f32.mrb[0].mxu0 }
  0xf4   : > { %v256_v20 = vpop.f32.mrb[1].mxu0 }
  0xf5   : > { %1149 = vmatprep.mubr.msk.f32.mxu1 %vm177_vm0, %v256_v20 }
  0xf6   : > { %1150 = vmatmul.mubr.msk.f32.vlgmr.msra.gmra.mrb[0].mxu1 %vm177_vm0, %v1141_v19 }
  0xf7   : > { %v1144_v21 = vpop.f32.mrb[2].mxu0  ;;  %1230 = vmatpush3.bf16.msra.mxu1 %v1435_v3 }
  0xf8   : > { %v266_v22 = vpop.f32.mrb[3].mxu0  ;;  %1236 = vmatprep.subr.bf16.mxu1 %v1435_v3 }
  0xf9   : > { %1152 = vmatprep.mubr.msk.f32.mxu1 %vm177_vm0, %v266_v22 }
  0xfa   : > { %1153 = vmatmul.mubr.msk.f32.gmra.mrb[2].mxu1 %vm177_vm0, %v1144_v21 }
  0xfb   : > { %v1161_v23 = vpop.f32.mrb[4].mxu0 }
  0xfc   : > { %v446_v24 = vpop.f32.mrb[5].mxu0 }
  0xfd   : > { %1169 = vmatprep.mubr.msk.f32.mxu1 %vm177_vm0, %v446_v24 }
  0xfe   : > { %1170 = vmatmul.mubr.msk.f32.vlgmr.msra.gmra.mrb[4].mxu1 %vm177_vm0, %v1161_v23 }
  0xff   : > { %v1164_v25 = vpop.f32.mrb[6].mxu0  ;;  %1238 = vmatpush3.bf16.msra.mxu1 %v1435_v3 }
 0x100   : > { %v456_v26 = vpop.f32.mrb[7].mxu0  ;;  %1244 = vmatprep.subr.bf16.mxu1 %v1435_v3 }
 0x101   : > { %1172 = vmatprep.mubr.msk.f32.mxu1 %vm177_vm0, %v456_v26 }
 0x102   : > { %1173 = vmatmul.mubr.msk.f32.gmra.mrb[6].mxu1 %vm177_vm0, %v1164_v25 }
 0x103   : > { %v1181_v27 = vpop.f32.mrb[8].mxu0 }
 0x104   : > { %v636_v28 = vpop.f32.mrb[9].mxu0 }
 0x105   : > { %1189 = vmatprep.mubr.msk.f32.mxu1 %vm177_vm0, %v636_v28 }
 0x106   : > { %1190 = vmatmul.mubr.msk.f32.vlgmr.msra.gmra.mrb[8].mxu1 %vm177_vm0, %v1181_v27 }
 0x107   : > { %v1184_v29 = vpop.f32.mrb[10].mxu0  ;;  %1246 = vmatpush3.bf16.msra.mxu1 %v1435_v3 }
 0x108   : > { %v646_v30 = vpop.f32.mrb[11].mxu0 }
 0x109   : > { %1192 = vmatprep.mubr.msk.f32.mxu1 %vm177_vm0, %v646_v30 }
 0x10a   : > { %1193 = vmatmul.mubr.msk.f32.gmra.mrb[10].mxu1 %vm177_vm0, %v1184_v29 }
 0x10b   : > { %v1201_v31 = vpop.f32.mrb[12].mxu0 }
 0x10c   : > { %v826_v32 = vpop.f32.mrb[13].mxu0 }
 0x10d   : > { %1209 = vmatprep.mubr.msk.f32.mxu1 %vm177_vm0, %v826_v32 }
 0x10e   : > { %1210 = vmatmul.mubr.msk.f32.vlgmr.msra.gmra.mrb[12].mxu1 %vm177_vm0, %v1201_v31 }
 0x10f   : > { %v1204_v33 = vpop.f32.mrb[14].mxu0 }
 0x110   : > { %v836_v34 = vpop.f32.mrb[15].mxu0 }
 0x111   : > { %1212 = vmatprep.mubr.msk.f32.mxu1 %vm177_vm0, %v836_v34 }
 0x112   : > { %1213 = vmatmul.mubr.msk.f32.gmra.mrb[14].mxu1 %vm177_vm0, %v1204_v33 }
 0x1c9   : > { %v1151_v35 = vpop.f32.mrb[0].mxu1 }
 0x1ca   : > { %374 = vst.msk [vmem:[%s1491_s25 + $0x8] sm:$0xff] %vm372_vm1, %v1151_v35  ;;  %v353_v36 = vpop.f32.mrb[1].mxu1 }
 0x1cb   : > { %373 = vst.msk [vmem:[%s1491_s25] sm:$0xff] %vm372_vm1, %v353_v36 }
 0x1cd   : > { %v1154_v37 = vpop.f32.mrb[2].mxu1 }
 0x1ce   : > { %376 = vst.msk [vmem:[%s1491_s25 + $0x18] sm:$0xff] %vm372_vm1, %v1154_v37  ;;  %v363_v38 = vpop.f32.mrb[3].mxu1 }
 0x1cf   : > { %375 = vst.msk [vmem:[%s1491_s25 + $0x10] sm:$0xff] %vm372_vm1, %v363_v38 }
 0x1d1   : > { %v1171_v39 = vpop.f32.mrb[4].mxu1 }
 0x1d2   : > { %1049 = vst.msk [vmem:[%s1491_s25 + $0x28] sm:$0xff] %vm372_vm1, %v1171_v39  ;;  %v543_v40 = vpop.f32.mrb[5].mxu1 }
 0x1d3   : > { %1048 = vst.msk [vmem:[%s1491_s25 + $0x20] sm:$0xff] %vm372_vm1, %v543_v40 }
 0x1d5   : > { %v1174_v41 = vpop.f32.mrb[6].mxu1 }
 0x1d6   : > { %1051 = vst.msk [vmem:[%s1491_s25 + $0x38] sm:$0xff] %vm372_vm1, %v1174_v41  ;;  %v553_v42 = vpop.f32.mrb[7].mxu1 }
 0x1d7   : > { %1050 = vst.msk [vmem:[%s1491_s25 + $0x30] sm:$0xff] %vm372_vm1, %v553_v42 }
 0x1d9   : > { %v1191_v43 = vpop.f32.mrb[8].mxu1 }
 0x1da   : > { %1063 = vst.msk [vmem:[%s1491_s25 + $0x48] sm:$0xff] %vm372_vm1, %v1191_v43  ;;  %v733_v44 = vpop.f32.mrb[9].mxu1 }
 0x1db   : > { %1062 = vst.msk [vmem:[%s1491_s25 + $0x40] sm:$0xff] %vm372_vm1, %v733_v44 }
 0x1dd   : > { %v1194_v45 = vpop.f32.mrb[10].mxu1 }
 0x1de   : > { %1065 = vst.msk [vmem:[%s1491_s25 + $0x58] sm:$0xff] %vm372_vm1, %v1194_v45  ;;  %v743_v46 = vpop.f32.mrb[11].mxu1 }
 0x1df   : > { %1064 = vst.msk [vmem:[%s1491_s25 + $0x50] sm:$0xff] %vm372_vm1, %v743_v46 }
 0x1e1   : > { %v1211_v47 = vpop.f32.mrb[12].mxu1 }
 0x1e2   : > { %1077 = vst.msk [vmem:[%s1491_s25 + $0x68] sm:$0xff] %vm372_vm1, %v1211_v47  ;;  %v923_v48 = vpop.f32.mrb[13].mxu1 }
 0x1e3   : > { %1076 = vst.msk [vmem:[%s1491_s25 + $0x60] sm:$0xff] %vm372_vm1, %v923_v48 }
 0x1e5   : > { %v1214_v49 = vpop.f32.mrb[14].mxu1 }
 0x1e6   : > { %1079 = vst.msk [vmem:[%s1491_s25 + $0x78] sm:$0xff] %vm372_vm1, %v1214_v49  ;;  %v933_v50 = vpop.f32.mrb[15].mxu1 }
 0x1e7   : > { %1078 = vst.msk [vmem:[%s1491_s25 + $0x70] sm:$0xff] %vm372_vm1, %v933_v50 }
 0x1e8   : > { %1301 = shalt.err (!%p1298_p3)
}
 0x1e9   : > { %s1302_s8 = scalar_lea.hbm %s1526_s30, 2048  ;;  %s1306_s11 = scalar_lea.hbm %s1580_s3, 4096 }
 0x1ea   : > { %p1303_p4 = scmp.ne.s32.totalorder %s1526_s30, %s1302_s8  ;;  %p1307_p9 = scmp.lt.u32.totalorder %s1526_s30, %s1580_s3 }
 0x1eb   : > { %p1308_p10 = scmp.lt.u32.totalorder %s1306_s11, %s1302_s8  ;;  %p1310_p12 = scmp.lt.u32.totalorder %s1302_s8, %s1526_s30 }
 0x1ec   : > { %p1304_p7 = pnand %p1303_p4, %p1413_p5 }
 0x1ed   : > { %p1309_p11 = por %p1308_p10, %p1307_p9 }
 0x1ee   : > { %p1305_p8 = pneg %p1304_p7 }
 0x1ef   : > { %p1311_p13 = por %p1310_p12, %p1309_p11 }
 0x1f1   : > { %p1312_p0 = pnand %p1311_p13, %p1305_p8 }
 0x1f3   : > { %1315 = shalt.err (!%p1312_p0)
}
 0x1f4   : > { %s1353_s20 = smov 128   ;;  %s1354_s24 = smov 8  }
 0x1f5   : > { %1247 = dma.vmem_to_hbm [thread:$0]  (%p1413_p5), %s1528_s27, 2048, %s1526_s30, %s1536_s16, %s1353_s20, %s1353_s20, %s1354_s24  }
 0x1f6 PF: > { %p1253_p1 = scmp.ge.s32.totalorder %s1350_s15, 2  ;;  %s976_s25 = sand.u32 1, %s1338_s12  }
 0x1f7   : > { %s977_s26 = scalar_lea.sflag [#allocation3], %s976_s25 }
 0x1f8   : > { %p1250_p2 = pnand %p1253_p1, %p1417_p6 }
 0x1fa   : > { %1333 = dma.done.wait (!%p1250_p2), %s977_s26, 2048  }
 0x1fb   : > { %1335 = vsyncadd (!%p1250_p2), %s977_s26, 4294965248  ;;  %p13_p3 = scmp.ge.s32.totalorder %s1400_s18, 4   ;;  %s1583_s12 = smov %s1342_s13 }
 0x1fc   : > { %s1584_s13 = smov %s1346_s14  ;;  %s1585_s14 = smov %s1411_s21 }
 0x1fd   : > { %s1586_s15 = smov %s1400_s18  ;;  %15 = sbr.rel (!%p13_p3) target bundleno = 3 (0x3), region = 73 }
 0x204   :  { %982 = vsyncpa [#allocation3], 1 }
 0x205   :  { %984 = vsyncpa [#allocation3 + $0x1], 1 }

</bundles_post_ra>
